<compile_context>
chip_gen: v6e
topology: v6e:2x2x1
jax: 0.10.0
libtpu: 0.0.40
codegen_flags: <defaults>
</compile_context>

<pallas_src>
import functools

import jax
import jax.numpy as jnp
from jax.experimental import pallas as pl
from jax.experimental.pallas import tpu as pltpu

HIDDEN = 128


def embedding_net_kernel(x_ref,
                         w1_ref, b1_ref,
                         w2_ref, b2_ref,
                         w3_ref, b3_ref,
                         w4_ref, b4_ref,
                         o_ref,
                         *, chunk_rows):
    # x_ref: (TB, dim) f32; w*_ref: (in, out) bf16; b*_ref: (1, out) f32.
    tb = x_ref.shape[0]

    # Weights/biases loaded once per grid step (VMEM-resident across steps).
    w1 = w1_ref[...]; b1 = b1_ref[...]
    w2 = w2_ref[...]; b2 = b2_ref[...]
    w3 = w3_ref[...]; b3 = b3_ref[...]
    w4 = w4_ref[...]; b4 = b4_ref[...]

    # Statically unrolled row-chunk loop: all 4 layers per chunk so
    # intermediates stay small and MXU/VPU work from adjacent chunks overlaps.
    r = 0
    while r < tb:
        rows = min(chunk_rows, tb - r)
        x = x_ref[r:r + rows, :].astype(jnp.bfloat16)

        h = jnp.dot(x, w1, preferred_element_type=jnp.float32) + b1
        h = jnp.maximum(h, 0.0)

        h = jnp.dot(h.astype(jnp.bfloat16), w2,
                    preferred_element_type=jnp.float32) + b2
        h = jnp.maximum(h, 0.0)

        h = jnp.dot(h.astype(jnp.bfloat16), w3,
                    preferred_element_type=jnp.float32) + b3
        h = jnp.maximum(h, 0.0)

        h = jnp.dot(h.astype(jnp.bfloat16), w4,
                    preferred_element_type=jnp.float32) + b4

        o_ref[r:r + rows, :] = h.astype(o_ref.dtype)
        r += rows


def _round_up(n, m):
    return ((n + m - 1) // m) * m


def _choose_batch_tile(B, block_b, min_split=256):
    """Pick a batch tile: full batch for small B, otherwise >=2 balanced
    8-aligned tiles (so v7x's two TensorCores both get work), capped at
    block_b so the VMEM budget stays safe on all generations."""
    if B <= min_split:
        return B  # full-extent block (allowed regardless of 8-alignment)
    n_tiles = max(2, pl.cdiv(B, block_b))
    tb = _round_up(pl.cdiv(B, n_tiles), 8)
    return min(tb, block_b)


def embedding_net_forward(x, params, *, block_b=2048, chunk_rows=512,
                          out_dtype=jnp.float32):
    """x: (B, dim) f32; params: list of 4 (W_(in,out) bf16, b_(1,out) f32).

    out_dtype=jnp.bfloat16 halves the dominant HBM output stream if the
    consumer tolerates it; default f32 matches the PyTorch module.
    """
    B, dim = x.shape
    (w1, b1), (w2, b2), (w3, b3), (w4, b4) = params

    TB = _choose_batch_tile(B, block_b)
    grid = (pl.cdiv(B, TB),)  # ragged last block handled by Pallas masking

    # Weights/biases stay resident in VMEM across all grid steps.
    resident = lambda shape: pl.BlockSpec(shape, lambda i: (0,) * len(shape))

    kernel = functools.partial(embedding_net_kernel,
                               chunk_rows=min(chunk_rows, TB))

    return pl.pallas_call(
        kernel,
        out_shape=jax.ShapeDtypeStruct((B, HIDDEN), out_dtype),
        grid_spec=pltpu.PrefetchScalarGridSpec(
            num_scalar_prefetch=0,
            grid=grid,
            in_specs=[
                pl.BlockSpec((TB, dim), lambda i: (i, 0)),
                resident(w1.shape), resident(b1.shape),
                resident(w2.shape), resident(b2.shape),
                resident(w3.shape), resident(b3.shape),
                resident(w4.shape), resident(b4.shape),
            ],
            out_specs=pl.BlockSpec((TB, HIDDEN), lambda i: (i, 0)),
        ),
        compiler_params=pltpu.CompilerParams(
            dimension_semantics=("parallel",)),
    )(x, w1, b1, w2, b2, w3, b3, w4, b4)


def init_linear(key, fan_in, fan_out):
    """Mimic torch.nn.Linear default init (uniform +/- 1/sqrt(fan_in)).
    Returns W (fan_in, fan_out) bf16 (MXU operand) and b (1, fan_out) f32."""
    kw, kb = jax.random.split(key)
    bound = 1.0 / jnp.sqrt(jnp.float32(fan_in))
    w = jax.random.uniform(kw, (fan_in, fan_out), jnp.float32, -bound, bound)
    b = jax.random.uniform(kb, (1, fan_out), jnp.float32, -bound, bound)
    return w.astype(jnp.bfloat16), b


if __name__ == "__main__":
    key = jax.random.PRNGKey(0)
    dim = 32  # context_dim

    k_x, k1, k2, k3, k4 = jax.random.split(key, 5)
    params = [
        init_linear(k1, dim, HIDDEN),
        init_linear(k2, HIDDEN, HIDDEN),
        init_linear(k3, HIDDEN, HIDDEN),
        init_linear(k4, HIDDEN, HIDDEN),
    ]

    # Pure-JAX reference with the same bf16-operand / f32-accumulate recipe.
    def ref(x, params):
        h = x
        for i, (w, b) in enumerate(params):
            h = jnp.dot(h.astype(jnp.bfloat16), w,
                        preferred_element_type=jnp.float32) + b
            if i < 3:
                h = jnp.maximum(h, 0.0)
        return h

    # 1) Small demo shape consistent with the module (single tile).
    batch = 8
    x = jax.random.normal(k_x, (batch, dim), jnp.float32)
    out = jax.block_until_ready(embedding_net_forward(x, params))
    assert out.shape == (batch, HIDDEN)
    assert jnp.allclose(out, ref(x, params), atol=5e-3, rtol=5e-3)

    # 2) Multi-tile + ragged-last-block path (cdiv grid, no pad / no slice).
    batch2 = 613
    x2 = jax.random.normal(k_x, (batch2, dim), jnp.float32)
    out2 = jax.block_until_ready(
        embedding_net_forward(x2, params, block_b=256))
    assert out2.shape == (batch2, HIDDEN)
    assert jnp.allclose(out2, ref(x2, params), atol=5e-3, rtol=5e-3)

    print("KERNEL_OK")
</pallas_src>

<mosaic_0001>
module attributes {stable_mosaic.version = 11 : i64} {
  func.func @embedding_net_kernel(%arg0: i32, %arg1: memref<8x32xf32, #tpu.memory_space<vmem>>, %arg2: memref<32x128xbf16, #tpu.memory_space<vmem>>, %arg3: memref<1x128xf32, #tpu.memory_space<vmem>>, %arg4: memref<128x128xbf16, #tpu.memory_space<vmem>>, %arg5: memref<1x128xf32, #tpu.memory_space<vmem>>, %arg6: memref<128x128xbf16, #tpu.memory_space<vmem>>, %arg7: memref<1x128xf32, #tpu.memory_space<vmem>>, %arg8: memref<128x128xbf16, #tpu.memory_space<vmem>>, %arg9: memref<1x128xf32, #tpu.memory_space<vmem>>, %arg10: memref<8x128xf32, #tpu.memory_space<vmem>>) attributes {dimension_semantics = [#tpu.dimension_semantics<parallel>], iteration_bounds = array<i64: 1>, scalar_prefetch = 0 : i64, scratch_operands = 0 : i64, tpu.core_type = #tpu.core_type<tc>, window_params = [{transform_indices = @transform_0, window_bounds = array<i64: 8, 32>}, {pipeline_mode = #tpu.pipeline_mode<synchronous>, transform_indices = @transform_1, window_bounds = array<i64: 32, 128>}, {pipeline_mode = #tpu.pipeline_mode<synchronous>, transform_indices = @transform_2, window_bounds = array<i64: 1, 128>}, {pipeline_mode = #tpu.pipeline_mode<synchronous>, transform_indices = @transform_3, window_bounds = array<i64: 128, 128>}, {pipeline_mode = #tpu.pipeline_mode<synchronous>, transform_indices = @transform_4, window_bounds = array<i64: 1, 128>}, {pipeline_mode = #tpu.pipeline_mode<synchronous>, transform_indices = @transform_5, window_bounds = array<i64: 128, 128>}, {pipeline_mode = #tpu.pipeline_mode<synchronous>, transform_indices = @transform_6, window_bounds = array<i64: 1, 128>}, {pipeline_mode = #tpu.pipeline_mode<synchronous>, transform_indices = @transform_7, window_bounds = array<i64: 128, 128>}, {pipeline_mode = #tpu.pipeline_mode<synchronous>, transform_indices = @transform_8, window_bounds = array<i64: 1, 128>}, {transform_indices = @transform_9, window_bounds = array<i64: 8, 128>}]} {
    %c0 = arith.constant 0 : index
    %c0_0 = arith.constant 0 : index
    %0 = vector.load %arg2[%c0, %c0_0] : memref<32x128xbf16, #tpu.memory_space<vmem>>, vector<32x128xbf16>
    %c0_1 = arith.constant 0 : index
    %c0_2 = arith.constant 0 : index
    %1 = vector.load %arg3[%c0_1, %c0_2] : memref<1x128xf32, #tpu.memory_space<vmem>>, vector<1x128xf32>
    %c0_3 = arith.constant 0 : index
    %c0_4 = arith.constant 0 : index
    %2 = vector.load %arg4[%c0_3, %c0_4] : memref<128x128xbf16, #tpu.memory_space<vmem>>, vector<128x128xbf16>
    %c0_5 = arith.constant 0 : index
    %c0_6 = arith.constant 0 : index
    %3 = vector.load %arg5[%c0_5, %c0_6] : memref<1x128xf32, #tpu.memory_space<vmem>>, vector<1x128xf32>
    %c0_7 = arith.constant 0 : index
    %c0_8 = arith.constant 0 : index
    %4 = vector.load %arg6[%c0_7, %c0_8] : memref<128x128xbf16, #tpu.memory_space<vmem>>, vector<128x128xbf16>
    %c0_9 = arith.constant 0 : index
    %c0_10 = arith.constant 0 : index
    %5 = vector.load %arg7[%c0_9, %c0_10] : memref<1x128xf32, #tpu.memory_space<vmem>>, vector<1x128xf32>
    %c0_11 = arith.constant 0 : index
    %c0_12 = arith.constant 0 : index
    %6 = vector.load %arg8[%c0_11, %c0_12] : memref<128x128xbf16, #tpu.memory_space<vmem>>, vector<128x128xbf16>
    %c0_13 = arith.constant 0 : index
    %c0_14 = arith.constant 0 : index
    %7 = vector.load %arg9[%c0_13, %c0_14] : memref<1x128xf32, #tpu.memory_space<vmem>>, vector<1x128xf32>
    %c0_15 = arith.constant 0 : index
    %c0_16 = arith.constant 0 : index
    %8 = vector.load %arg1[%c0_15, %c0_16] : memref<8x32xf32, #tpu.memory_space<vmem>>, vector<8x32xf32>
    %9 = arith.truncf %8 : vector<8x32xf32> to vector<8x32xbf16>
    %cst = arith.constant dense<0.000000e+00> : vector<8x128xf32>
    %10 = tpu.matmul %9, %0, %cst {dimension_numbers = #tpu.dot_dimension_numbers<[1], [0], [0], [1], [0, 0, 1, 1], [], []>} : vector<8x32xbf16>, vector<32x128xbf16>, vector<8x128xf32> -> vector<8x128xf32>
    %11 = vector.broadcast %1 : vector<1x128xf32> to vector<8x128xf32>
    %12 = arith.addf %10, %11 : vector<8x128xf32>
    %cst_17 = arith.constant 0.000000e+00 : f32
    %13 = vector.broadcast %cst_17 : f32 to vector<8x128xf32>
    %14 = arith.maximumf %12, %13 : vector<8x128xf32>
    %15 = arith.truncf %14 : vector<8x128xf32> to vector<8x128xbf16>
    %cst_18 = arith.constant dense<0.000000e+00> : vector<8x128xf32>
    %16 = tpu.matmul %15, %2, %cst_18 {dimension_numbers = #tpu.dot_dimension_numbers<[1], [0], [0], [1], [0, 0, 1, 1], [], []>} : vector<8x128xbf16>, vector<128x128xbf16>, vector<8x128xf32> -> vector<8x128xf32>
    %17 = vector.broadcast %3 : vector<1x128xf32> to vector<8x128xf32>
    %18 = arith.addf %16, %17 : vector<8x128xf32>
    %cst_19 = arith.constant 0.000000e+00 : f32
    %19 = vector.broadcast %cst_19 : f32 to vector<8x128xf32>
    %20 = arith.maximumf %18, %19 : vector<8x128xf32>
    %21 = arith.truncf %20 : vector<8x128xf32> to vector<8x128xbf16>
    %cst_20 = arith.constant dense<0.000000e+00> : vector<8x128xf32>
    %22 = tpu.matmul %21, %4, %cst_20 {dimension_numbers = #tpu.dot_dimension_numbers<[1], [0], [0], [1], [0, 0, 1, 1], [], []>} : vector<8x128xbf16>, vector<128x128xbf16>, vector<8x128xf32> -> vector<8x128xf32>
    %23 = vector.broadcast %5 : vector<1x128xf32> to vector<8x128xf32>
    %24 = arith.addf %22, %23 : vector<8x128xf32>
    %cst_21 = arith.constant 0.000000e+00 : f32
    %25 = vector.broadcast %cst_21 : f32 to vector<8x128xf32>
    %26 = arith.maximumf %24, %25 : vector<8x128xf32>
    %27 = arith.truncf %26 : vector<8x128xf32> to vector<8x128xbf16>
    %cst_22 = arith.constant dense<0.000000e+00> : vector<8x128xf32>
    %28 = tpu.matmul %27, %6, %cst_22 {dimension_numbers = #tpu.dot_dimension_numbers<[1], [0], [0], [1], [0, 0, 1, 1], [], []>} : vector<8x128xbf16>, vector<128x128xbf16>, vector<8x128xf32> -> vector<8x128xf32>
    %29 = vector.broadcast %7 : vector<1x128xf32> to vector<8x128xf32>
    %30 = arith.addf %28, %29 : vector<8x128xf32>
    %c0_23 = arith.constant 0 : index
    %c0_24 = arith.constant 0 : index
    %31 = vector.load %arg10[%c0_23, %c0_24] : memref<8x128xf32, #tpu.memory_space<vmem>>, vector<8x128xf32>
    tpu.vector_store %arg10[%c0_23, %c0_24], %30 {strides = array<i32>} : memref<8x128xf32, #tpu.memory_space<vmem>>, vector<8x128xf32>,
    return
  }
  func.func @transform_0(%arg0: i32) -> (i32, i32) {
    %c0_i32 = arith.constant 0 : i32
    %c0_i32_0 = arith.constant 0 : i32
    return %arg0, %c0_i32 : i32, i32
  }
  func.func @transform_1(%arg0: i32) -> (i32, i32) {
    %c0_i32 = arith.constant 0 : i32
    %c0_i32_0 = arith.constant 0 : i32
    %c0_i32_1 = arith.constant 0 : i32
    return %c0_i32, %c0_i32_0 : i32, i32
  }
  func.func @transform_2(%arg0: i32) -> (i32, i32) {
    %c0_i32 = arith.constant 0 : i32
    %c0_i32_0 = arith.constant 0 : i32
    %c0_i32_1 = arith.constant 0 : i32
    return %c0_i32, %c0_i32_0 : i32, i32
  }
  func.func @transform_3(%arg0: i32) -> (i32, i32) {
    %c0_i32 = arith.constant 0 : i32
    %c0_i32_0 = arith.constant 0 : i32
    %c0_i32_1 = arith.constant 0 : i32
    return %c0_i32, %c0_i32_0 : i32, i32
  }
  func.func @transform_4(%arg0: i32) -> (i32, i32) {
    %c0_i32 = arith.constant 0 : i32
    %c0_i32_0 = arith.constant 0 : i32
    %c0_i32_1 = arith.constant 0 : i32
    return %c0_i32, %c0_i32_0 : i32, i32
  }
  func.func @transform_5(%arg0: i32) -> (i32, i32) {
    %c0_i32 = arith.constant 0 : i32
    %c0_i32_0 = arith.constant 0 : i32
    %c0_i32_1 = arith.constant 0 : i32
    return %c0_i32, %c0_i32_0 : i32, i32
  }
  func.func @transform_6(%arg0: i32) -> (i32, i32) {
    %c0_i32 = arith.constant 0 : i32
    %c0_i32_0 = arith.constant 0 : i32
    %c0_i32_1 = arith.constant 0 : i32
    return %c0_i32, %c0_i32_0 : i32, i32
  }
  func.func @transform_7(%arg0: i32) -> (i32, i32) {
    %c0_i32 = arith.constant 0 : i32
    %c0_i32_0 = arith.constant 0 : i32
    %c0_i32_1 = arith.constant 0 : i32
    return %c0_i32, %c0_i32_0 : i32, i32
  }
  func.func @transform_8(%arg0: i32) -> (i32, i32) {
    %c0_i32 = arith.constant 0 : i32
    %c0_i32_0 = arith.constant 0 : i32
    %c0_i32_1 = arith.constant 0 : i32
    return %c0_i32, %c0_i32_0 : i32, i32
  }
  func.func @transform_9(%arg0: i32) -> (i32, i32) {
    %c0_i32 = arith.constant 0 : i32
    %c0_i32_0 = arith.constant 0 : i32
    return %arg0, %c0_i32 : i32, i32
  }
}

</mosaic_0001>

<bundles_post_ra>
// kernel: tpu_custom_call.1
= control target key start
LH: loop header
LB: loop body
LE: loop exit
PB: predicated region body
PF: predicated region fallthrough
CT: control target
= control target key end

     0   :  { %14 = vsyncpa [#allocation3], 0  ;;  %s955_s0 = inlined_call_operand.hbm [shape: f32[8,32], index: 0, kind: input, shape index: {}]   ;;  %s956_s1 = inlined_call_operand.hbm [shape: bf16[32,128], index: 1, kind: input, shape index: {}]   ;;  %s957_s2 = inlined_call_operand.vmem [shape: f32[1,128], index: 2, kind: input, shape index: {}]   ;;  %s958_s3 = inlined_call_operand.hbm [shape: bf16[128,128], index: 3, kind: input, shape index: {}]   ;;  %s959_s4 = inlined_call_operand.vmem [shape: f32[1,128], index: 4, kind: input, shape index: {}]   ;;  %s960_s5 = inlined_call_operand.hbm [shape: bf16[128,128], index: 5, kind: input, shape index: {}]   ;;  %s961_s6 = inlined_call_operand.vmem [shape: f32[1,128], index: 6, kind: input, shape index: {}]   ;;  %s962_s7 = inlined_call_operand.hbm [shape: bf16[128,128], index: 7, kind: input, shape index: {}]   ;;  %s963_s8 = inlined_call_operand.vmem [shape: f32[1,128], index: 8, kind: input, shape index: {}]   ;;  %s964_s9 = inlined_call_operand.hbm [shape: f32[8,128], index: 9, kind: output, shape index: {}]  }
   0x1   :  { %15 = vsyncpa [#allocation6], 0 }
   0x2   :  { %16 = vsyncpa [#allocation9], 0 }
   0x3   :  { %17 = vsyncpa [#allocation4], 0  ;;  %s819_s30 = smov [#allocation5]  }
   0x4   :  { %s33_s10 = sshll.u32 %s819_s30, 4  ;;  %s34_s10 = int_to_ptr.vmem [resolvable:$true] %s33_s10 }
   0x5   :  { %s699_s11 = scalar_lea.vmem %s34_s10, 256  ;;  %p704_p1 = scmp.lt.s32.totalorder %s34_s10, %s34_s10 }
   0x6   :  { %p700_p0 = scmp.ne.s32.totalorder %s34_s10, %s699_s11  ;;  %p705_p2 = scmp.lt.s32.totalorder %s699_s11, %s699_s11 }
   0x8   :  { %p706_p3 = por %p705_p2, %p704_p1 }
   0xa   :  { %p707_p4 = pnand %p706_p3, %p700_p0 }
   0xc   :  { %710 = shalt.err (!%p707_p4)
}
   0xd   :  { %s820_s12 = smov 64   ;;  %s821_s13 = smov 4  }
   0xe   :  { %39 = dma.hbm_to_vmem [thread:$0]  %s956_s1, 256, %s34_s10, [#allocation6], %s820_s12, %s820_s12, %s821_s13  }
   0xf   :  { %s822_s16 = smov [#allocation8]   ;;  %s823_s18 = smov [#allocation2]  }
  0x10   :  { %s61_s17 = sshll.u32 %s822_s16, 4  ;;  %s24_s19 = sshll.u32 %s823_s18, 4  ;;  %s62_s17 = int_to_ptr.vmem [resolvable:$true] %s61_s17  ;;  %s25_s19 = int_to_ptr.vmem [resolvable:$true] %s24_s19 }
  0x11   :  { %s719_s20 = scalar_lea.vmem %s62_s17, 1024  ;;  %p724_p6 = scmp.lt.s32.totalorder %s62_s17, %s62_s17 }
  0x12   :  { %p720_p5 = scmp.ne.s32.totalorder %s62_s17, %s719_s20  ;;  %p725_p7 = scmp.lt.s32.totalorder %s719_s20, %s719_s20 }
  0x14   :  { %p726_p8 = por %p725_p7, %p724_p6 }
  0x16   :  { %p727_p9 = pnand %p726_p8, %p720_p5 }
  0x18   :  { %730 = shalt.err (!%p727_p9)
}
  0x19   :  { %67 = dma.hbm_to_vmem [thread:$0]  %s960_s5, 1024, %s62_s17, [#allocation9], %s820_s12, %s820_s12, %s821_s13  }
  0x1a   :  { %s739_s1 = scalar_lea.vmem %s25_s19, 128  ;;  %p744_p11 = scmp.lt.s32.totalorder %s25_s19, %s25_s19 }
  0x1b   :  { %p740_p10 = scmp.ne.s32.totalorder %s25_s19, %s739_s1  ;;  %p745_p12 = scmp.lt.s32.totalorder %s739_s1, %s739_s1 }
  0x1d   :  { %p746_p13 = por %p745_p12, %p744_p11 }
  0x1f   :  { %p747_p0 = pnand %p746_p13, %p740_p10 }
  0x21   :  { %750 = shalt.err (!%p747_p0)
}
  0x22   :  { %27 = dma.hbm_to_vmem [thread:$0]  %s955_s0, 128, %s25_s19, [#allocation3]  }
  0x23   :  { %s824_s25 = smov [#allocation7]   ;;  %s825_s27 = smov [#allocation10]  }
  0x24   :  { %s47_s26 = sshll.u32 %s824_s25, 4  ;;  %s75_s28 = sshll.u32 %s825_s27, 4  ;;  %s48_s26 = int_to_ptr.vmem [resolvable:$true] %s47_s26  ;;  %s76_s28 = int_to_ptr.vmem [resolvable:$true] %s75_s28 }
  0x25   :  { %s759_s29 = scalar_lea.vmem %s48_s26, 1024  ;;  %p764_p2 = scmp.lt.s32.totalorder %s48_s26, %s48_s26 }
  0x26   :  { %p760_p1 = scmp.ne.s32.totalorder %s48_s26, %s759_s29  ;;  %p765_p3 = scmp.lt.s32.totalorder %s759_s29, %s759_s29 }
  0x28   :  { %p766_p4 = por %p765_p3, %p764_p2 }
  0x2a   :  { %p767_p5 = pnand %p766_p4, %p760_p1 }
  0x2c   :  { %770 = shalt.err (!%p767_p5)
}
  0x2d   :  { %53 = dma.hbm_to_vmem [thread:$0]  %s958_s3, 1024, %s48_s26, [#allocation6], %s820_s12, %s820_s12, %s821_s13  }
  0x2e   :  { %s779_s0 = scalar_lea.vmem %s76_s28, 1024  ;;  %p784_p7 = scmp.lt.s32.totalorder %s76_s28, %s76_s28 }
  0x2f   :  { %p780_p6 = scmp.ne.s32.totalorder %s76_s28, %s779_s0  ;;  %p785_p8 = scmp.lt.s32.totalorder %s779_s0, %s779_s0 }
  0x31   :  { %p786_p9 = por %p785_p8, %p784_p7 }
  0x33   :  { %p787_p10 = pnand %p786_p9, %p780_p6 }
  0x35   :  { %790 = shalt.err (!%p787_p10)
}
  0x36   :  { %81 = dma.hbm_to_vmem [thread:$0]  %s962_s7, 1024, %s76_s28, [#allocation9], %s820_s12, %s820_s12, %s821_s13  }
  0x37   :  { %811 = dma.done.wait [#allocation3], 128  }
  0x38   :  { %812 = vsyncadd [#allocation3], 4294967168 }
  0x39   :  { %813 = dma.done.wait [#allocation6], 1280  }
  0x3a   :  { %814 = vsyncadd [#allocation6], 4294966016 }
  0x3b   :  { %815 = dma.done.wait [#allocation9], 2048  }
  0x3c   :  { %816 = vsyncadd [#allocation9], 4294965248  ;;  %v826_v0 = vmov 0.0   ;;  %vm827_vm0 = vmmov 0   ;;  %v665_v1 = vld [vmem:[#allocation5 + $0x8] sm:$0xff]   ;;  %v666_v2 = vld [vmem:[#allocation5] sm:$0xff]  }
  0x3d   :  { %587 = vmatprep.subr.bf16.mxu0 %v826_v0  ;;  %591 = vmatprep.mubr.msk.bf16.mxu0 %vm827_vm0, %v826_v0  ;;  %v156_v3 = vld [vmem:[#allocation2] sm:$0xff]  ;;  %v667_v4 = vld [vmem:[#allocation7 + $0x38] sm:$0xff]   ;;  %v668_v6 = vld [vmem:[#allocation7 + $0x30] sm:$0xff]   ;;  %vm176_vm1 = vcmask 261120   ;;  %s828_s16 = smov [#allocation11]  }
  0x3e   :  { %595 = vmatprep.subr.bf16.mxu1 %v826_v0  ;;  %611 = vmatprep.mubr.msk.bf16.mxu1 %vm827_vm0, %v826_v0  ;;  %v157_v5 = vpack.c.bf16 %v156_v3, %v156_v3  ;;  %v669_v7 = vld [vmem:[#allocation7 + $0x28] sm:$0xff]   ;;  %v670_v8 = vld [vmem:[#allocation7 + $0x20] sm:$0xff]   ;;  %v671_v9 = vld [vmem:[#allocation7 + $0x18] sm:$0xff]   ;;  %s515_s17 = sshll.u32 %s828_s16, 4  ;;  %s516_s17 = int_to_ptr.vmem [resolvable:$true] %s515_s17 }
  0x3f   :  { %588 = vmatpush3.bf16.msra.mxu0 %v665_v1  ;;  %596 = vmatpush3.bf16.msra.mxu1 %v667_v4  ;;  %v672_v10 = vld [vmem:[#allocation7 + $0x10] sm:$0xff]   ;;  %v673_v11 = vld [vmem:[#allocation7 + $0x8] sm:$0xff]   ;;  %v674_v12 = vld [vmem:[#allocation7] sm:$0xff]   ;;  %p796_p12 = scmp.lt.s32.totalorder %s516_s17, %s516_s17 }
  0x40   :  { %589 = vmatprep.subr.bf16.mxu0 %v826_v0  ;;  %597 = vmatprep.subr.bf16.mxu1 %v826_v0  ;;  %v675_v13 = vld [vmem:[#allocation8 + $0x38] sm:$0xff]   ;;  %v676_v14 = vld [vmem:[#allocation8 + $0x30] sm:$0xff]   ;;  %v677_v15 = vld [vmem:[#allocation8 + $0x28] sm:$0xff]  }
  0x41   :  { %v678_v16 = vld [vmem:[#allocation8 + $0x20] sm:$0xff]   ;;  %v679_v17 = vld [vmem:[#allocation8 + $0x18] sm:$0xff]   ;;  %v680_v18 = vld [vmem:[#allocation8 + $0x10] sm:$0xff]  }
  0x42   :  { %v526_v19 = vld [vmem:[%s957_s2] ss:$0 sm:$0xff]  ;;  %v682_v28 = vld [vmem:[#allocation8] sm:$0xff]   ;;  %v683_v29 = vld [vmem:[#allocation10 + $0x38] sm:$0xff]  }
  0x43   :  { %590 = vmatpush3.bf16.msra.mxu0 %v666_v2  ;;  %598 = vmatpush3.bf16.msra.mxu1 %v668_v6  ;;  %v681_v27 = vld [vmem:[#allocation8 + $0x8] sm:$0xff]   ;;  %v684_v30 = vld [vmem:[#allocation10 + $0x30] sm:$0xff]   ;;  %v686_v32 = vld [vmem:[#allocation10 + $0x20] sm:$0xff]  }
  0x44   :  { %615 = vmatprep.subr.bf16.mxu0 %v826_v0  ;;  %599 = vmatprep.subr.bf16.mxu1 %v826_v0  ;;  %v685_v31 = vld [vmem:[#allocation10 + $0x28] sm:$0xff]   ;;  %v687_v33 = vld [vmem:[#allocation10 + $0x18] sm:$0xff]   ;;  %v688_v34 = vld [vmem:[#allocation10 + $0x10] sm:$0xff]  }
  0x45   :  { %v530_v35 = vld [vmem:[%s959_s4] ss:$0 sm:$0xff]  ;;  %v690_v44 = vld [vmem:[#allocation10] sm:$0xff]  }
  0x46   :  { %592 = vmatmul.mubr.msk.bf16.vlgmr.msra.gmra.mxu0 %vm176_vm1, %v157_v5  ;;  %v689_v43 = vld [vmem:[#allocation10 + $0x8] sm:$0xff]  }
  0x47   :  { %631 = vmatprep.mubr.msk.bf16.mxu0 %vm827_vm0, %v826_v0  ;;  %600 = vmatpush3.bf16.msra.mxu1 %v669_v7  ;;  %v539_v45 = vld [vmem:[%s961_s6] ss:$0 sm:$0xff]  ;;  %s791_s6 = scalar_lea.vmem %s516_s17, 128 }
  0x48   :  { %601 = vmatprep.subr.bf16.mxu1 %v826_v0  ;;  %616 = vmatpush3.bf16.msra.mxu0 %v675_v13  ;;  %v548_v53 = vld [vmem:[%s963_s8] ss:$0 sm:$0xff]  ;;  %p792_p11 = scmp.ne.s32.totalorder %s516_s17, %s791_s6  ;;  %p797_p13 = scmp.lt.s32.totalorder %s791_s6, %s791_s6 }
  0x49   :  { %617 = vmatprep.subr.bf16.mxu0 %v826_v0 }
  0x4a   :  { %p798_p0 = por %p797_p13, %p796_p12 }
  0x4b   :  { %602 = vmatpush3.bf16.msra.mxu1 %v670_v8 }
  0x4c   :  { %603 = vmatprep.subr.bf16.mxu1 %v826_v0  ;;  %618 = vmatpush3.bf16.msra.mxu0 %v676_v14  ;;  %p799_p1 = pnand %p798_p0, %p792_p11 }
  0x4d   :  { %619 = vmatprep.subr.bf16.mxu0 %v826_v0 }
  0x4f   :  { %604 = vmatpush3.bf16.msra.mxu1 %v671_v9 }
  0x50   :  { %605 = vmatprep.subr.bf16.mxu1 %v826_v0  ;;  %620 = vmatpush3.bf16.msra.mxu0 %v677_v15 }
  0x51   :  { %621 = vmatprep.subr.bf16.mxu0 %v826_v0 }
  0x53   :  { %606 = vmatpush3.bf16.msra.mxu1 %v672_v10 }
  0x54   :  { %607 = vmatprep.subr.bf16.mxu1 %v826_v0  ;;  %622 = vmatpush3.bf16.msra.mxu0 %v678_v16 }
  0x55   :  { %623 = vmatprep.subr.bf16.mxu0 %v826_v0 }
  0x57   :  { %608 = vmatpush3.bf16.msra.mxu1 %v673_v11 }
  0x58   :  { %609 = vmatprep.subr.bf16.mxu1 %v826_v0  ;;  %624 = vmatpush3.bf16.msra.mxu0 %v679_v17 }
  0x59   :  { %625 = vmatprep.subr.bf16.mxu0 %v826_v0 }
  0x5b   :  { %610 = vmatpush3.bf16.msra.mxu1 %v674_v12 }
  0x5c   :  { %635 = vmatprep.subr.bf16.mxu1 %v826_v0  ;;  %626 = vmatpush3.bf16.msra.mxu0 %v680_v18 }
  0x5d   :  { %627 = vmatprep.subr.bf16.mxu0 %v826_v0 }
  0x60   :  { %628 = vmatpush3.bf16.msra.mxu0 %v681_v27 }
  0x61   :  { %629 = vmatprep.subr.bf16.mxu0 %v826_v0 }
  0x64   :  { %630 = vmatpush3.bf16.msra.mxu0 %v682_v28 }
 0x106   :  { %v214_v20 = vpop.f32.mrf.mxu0 }
 0x107   :  { %v215_v21 = vadd.f32 %v526_v19, %v214_v20 }
 0x108   :  { %v593_v22 = vpop.f32.mrf.mxu0 }
 0x109   :  { %v220_v23 = vmax.f32 %v215_v21, 0.0 }
 0x10a   :  { %v217_v24 = vpop.f32.mrf.mxu0 }
 0x10b   :  { %v221_v25 = vpack.c.bf16 %v220_v23, %v220_v23 }
 0x10c   :  { %v594_v26 = vpop.f32.mrf.mxu0 }
 0x10d   :  { %612 = vmatmul.mubr.bf16.vlgmr.msra.gmra.mxu1 %v221_v25 }
 0x10e   :  { %651 = vmatprep.mubr.msk.bf16.mxu1 %vm827_vm0, %v826_v0  ;;  %636 = vmatpush3.bf16.msra.mxu1 %v683_v29 }
 0x10f   :  { %637 = vmatprep.subr.bf16.mxu1 %v826_v0 }
 0x112   :  { %638 = vmatpush3.bf16.msra.mxu1 %v684_v30 }
 0x113   :  { %639 = vmatprep.subr.bf16.mxu1 %v826_v0 }
 0x116   :  { %640 = vmatpush3.bf16.msra.mxu1 %v685_v31 }
 0x117   :  { %641 = vmatprep.subr.bf16.mxu1 %v826_v0 }
 0x11a   :  { %642 = vmatpush3.bf16.msra.mxu1 %v686_v32 }
 0x11b   :  { %643 = vmatprep.subr.bf16.mxu1 %v826_v0 }
 0x11e   :  { %644 = vmatpush3.bf16.msra.mxu1 %v687_v33 }
 0x11f   :  { %645 = vmatprep.subr.bf16.mxu1 %v826_v0 }
 0x122   :  { %646 = vmatpush3.bf16.msra.mxu1 %v688_v34 }
 0x123   :  { %647 = vmatprep.subr.bf16.mxu1 %v826_v0 }
 0x126   :  { %648 = vmatpush3.bf16.msra.mxu1 %v689_v43 }
 0x127   :  { %649 = vmatprep.subr.bf16.mxu1 %v826_v0 }
 0x12a   :  { %650 = vmatpush3.bf16.msra.mxu1 %v690_v44 }
 0x1cd   :  { %v310_v36 = vpop.f32.mrf.mxu1 }
 0x1ce   :  { %v311_v37 = vadd.f32 %v530_v35, %v310_v36 }
 0x1cf   :  { %v613_v38 = vpop.f32.mrf.mxu1 }
 0x1d0   :  { %v316_v39 = vmax.f32 %v311_v37, 0.0 }
 0x1d1   :  { %v313_v40 = vpop.f32.mrf.mxu1 }
 0x1d2   :  { %v317_v41 = vpack.c.bf16 %v316_v39, %v316_v39 }
 0x1d3   :  { %v614_v42 = vpop.f32.mrf.mxu1 }
 0x1d4   :  { %632 = vmatmul.mubr.bf16.vlgmr.msra.gmra.mxu0 %v317_v41 }
 0x294   :  { %v406_v46 = vpop.f32.mrf.mxu0 }
 0x295   :  { %v407_v47 = vadd.f32 %v539_v45, %v406_v46 }
 0x296   :  { %v633_v48 = vpop.f32.mrf.mxu0 }
 0x297   :  { %v412_v49 = vmax.f32 %v407_v47, 0.0 }
 0x298   :  { %v409_v50 = vpop.f32.mrf.mxu0 }
 0x299   :  { %v413_v51 = vpack.c.bf16 %v412_v49, %v412_v49 }
 0x29a   :  { %v634_v52 = vpop.f32.mrf.mxu0 }
 0x29b   :  { %652 = vmatmul.mubr.bf16.vlgmr.msra.gmra.mxu1 %v413_v51 }
 0x35b   :  { %v502_v54 = vpop.f32.mrf.mxu1 }
 0x35c   :  { %v503_v55 = vadd.f32 %v548_v53, %v502_v54 }
 0x35d   :  { %v653_v56 = vpop.f32.mrf.mxu1 }
 0x35e   :  { %508 = vst [vmem:[#allocation11] sm:$0xff] %v503_v55 }
 0x35f   :  { %v505_v57 = vpop.f32.mrf.mxu1 }
 0x360   :  { %802 = shalt.err (!%p799_p1)
}
 0x361   :  { %518 = dma.vmem_to_hbm [thread:$0]  %s516_s17, 128, %s964_s9, [#allocation4]   ;;  %v654_v58 = vpop.f32.mrf.mxu1 }
 0x362   :  { %817 = dma.done.wait [#allocation4], 128  }
 0x363   :  { %818 = vsyncadd [#allocation4], 4294967168 }
 0x364   :  { %522 = vsyncpa [#allocation3], 1 }
 0x365   :  { %523 = vsyncpa [#allocation6], 1 }
 0x366   :  { %524 = vsyncpa [#allocation9], 1 }
 0x367   :  { %525 = vsyncpa [#allocation4], 1 }

</bundles_post_ra>
